<compile_context>
chip_gen: v7x
topology: tpu7x:2x2x1
jax: 0.10.0
libtpu: 0.0.40
codegen_flags: <defaults>
</compile_context>

<pallas_src>
from functools import partial

import jax
import jax.numpy as jnp
from jax.experimental import pallas as pl
from jax.experimental.pallas import tpu as pltpu

GAMMA = 0.2          # module-level `gamma` in the reference
THRESH_DECAY = 0.7   # module-level `thresh_decay` in the reference

_LANE_CHOICES = (1024, 512, 256, 128)   # lane-dense last dims (multiples of 128)
_MAX_BLOCK_ELEMS = 512 * 1024           # 2 MiB per f32 tile
_VMEM_LIMIT = 48 << 20                  # <= ~48 MiB so the config also fits v7x


# --------------------------------------------------------------------------
# layout helpers (copy-free on the common path)
# --------------------------------------------------------------------------
def _slab_layout(n):
    """Pick a lane width L that divides n so the (rows, L) view needs no pad."""
    for lane in _LANE_CHOICES:
        if n % lane == 0:
            return n // lane, lane, False
    # TODO(synk): ragged sizes (n % 128 != 0) fall back to a pad+slice copy;
    # keep producers at sizes divisible by 128 to stay on the copy-free path.
    lane = 128
    return pl.cdiv(n, lane), lane, True


def _choose_block_rows(rows, lane):
    """Row-block size: big tiles, but keep >= ~4 blocks for pipelining/megacore."""
    if rows <= 8:
        return rows                       # single full-extent block (tiny input)
    max_rows = max(8, _MAX_BLOCK_ELEMS // lane)
    target = max(8, (rows // 4) // 8 * 8)  # aim for >= 4 row blocks
    return min(target, max_rows)


def _to_slab(x, rows, lane, padded):
    flat = x.reshape(-1)
    if padded:
        flat = jnp.pad(flat, (0, rows * lane - flat.shape[0]))
    return flat.reshape(rows, lane)


def _to_slab_seq(x, T, rows, lane, padded):
    flat = x.reshape(T, -1)
    if padded:
        flat = jnp.pad(flat, ((0, 0), (0, rows * lane - flat.shape[1])))
    return flat.reshape(T, rows, lane)


def _from_slab(slab, n, shape, padded):
    if padded:
        return slab.reshape(-1)[:n].reshape(shape)
    return slab.reshape(shape)


# --------------------------------------------------------------------------
# single-step kernel (mirrors LIF.forward exactly)
# --------------------------------------------------------------------------
def _make_lif_kernel(inv_tau, v_reset, gamma, thresh_decay):
    def kernel(dv_ref, v_ref, vth_ref, spike_ref, v_out_ref, vth_out_ref):
        dv = dv_ref[...].astype(jnp.float32)     # dv may arrive as bf16
        v_old = v_ref[...]
        vth = vth_ref[...]

        # Leaky integrate (divide folded into a constant multiply).
        v = v_old + (dv - (v_old - v_reset)) * inv_tau
        # Surrogate forward == Heaviside(v - v_th).
        fired = (v - vth) > 0.0
        spike_ref[...] = fired.astype(spike_ref.dtype)
        # Hard reset + adaptive threshold update via selects.
        v_out_ref[...] = jnp.where(fired, v_reset, v)
        vth_out_ref[...] = jnp.where(fired, gamma + vth * thresh_decay,
                                     vth * thresh_decay)
    return kernel


@partial(jax.jit, static_argnames=("tau", "v_reset", "spike_dtype"))
def lif_forward(dv, v, v_th, *, tau=1.0, v_reset=0.0, spike_dtype=jnp.float32):
    """One LIF step.  dv / v / v_th share any shape.

    Returns (spike, v_new, v_th_new).  dv may be bf16; v / v_th are f32 state.
    `spike_dtype=jnp.int8` cuts the spike write stream if the consumer accepts it.
    """
    shape = dv.shape
    n = dv.size
    rows, lane, padded = _slab_layout(n)
    block_rows = _choose_block_rows(rows, lane)

    dv2 = _to_slab(dv, rows, lane, padded)                       # keep input dtype
    v2 = _to_slab(v.astype(jnp.float32), rows, lane, padded)
    vth2 = _to_slab(v_th.astype(jnp.float32), rows, lane, padded)

    spec = pl.BlockSpec((block_rows, lane), lambda i: (i, 0))
    f32_out = jax.ShapeDtypeStruct((rows, lane), jnp.float32)
    spike_out = jax.ShapeDtypeStruct((rows, lane), spike_dtype)

    spike2, v_new2, vth_new2 = pl.pallas_call(
        _make_lif_kernel(1.0 / float(tau), float(v_reset), GAMMA, THRESH_DECAY),
        out_shape=(spike_out, f32_out, f32_out),
        grid=(pl.cdiv(rows, block_rows),),
        in_specs=[spec, spec, spec],
        out_specs=(spec, spec, spec),
        compiler_params=pltpu.CompilerParams(
            dimension_semantics=("parallel",),
            vmem_limit_bytes=_VMEM_LIMIT),
    )(dv2, v2, vth2)

    return (_from_slab(spike2, n, shape, padded),
            _from_slab(v_new2, n, shape, padded),
            _from_slab(vth_new2, n, shape, padded))


# --------------------------------------------------------------------------
# fused multi-timestep kernel: v / v_th live in the VMEM-resident output
# blocks (constant index along t) for the whole sequence -- no scratch,
# no epilogue copy, no per-step HBM round-trip of the state.
# --------------------------------------------------------------------------
def _make_lif_seq_kernel(inv_tau, v_reset, gamma, thresh_decay):
    def kernel(dv_ref, v_in_ref, vth_in_ref, spike_ref, v_ref, vth_ref):
        t = pl.program_id(1)

        @pl.when(t == 0)
        def _():
            v_ref[...] = v_in_ref[...]
            vth_ref[...] = vth_in_ref[...]

        v_old = v_ref[...]
        vth = vth_ref[...]
        v = v_old + (dv_ref[...].astype(jnp.float32) - (v_old - v_reset)) * inv_tau
        fired = (v - vth) > 0.0
        spike_ref[...] = fired.astype(spike_ref.dtype)
        v_ref[...] = jnp.where(fired, v_reset, v)
        vth_ref[...] = jnp.where(fired, gamma + vth * thresh_decay,
                                 vth * thresh_decay)
    return kernel


@partial(jax.jit, static_argnames=("tau", "v_reset", "spike_dtype"))
def lif_forward_sequence(dv_seq, v, v_th, *, tau=1.0, v_reset=0.0,
                         spike_dtype=jnp.float32):
    """Run T LIF steps.  dv_seq has shape (T, *state_shape).

    Returns (spikes[T, ...], v_new, v_th_new).  Prefer this over looping
    lif_forward: the state never round-trips HBM between steps.
    """
    T = dv_seq.shape[0]
    state_shape = dv_seq.shape[1:]
    n = v.size
    rows, lane, padded = _slab_layout(n)
    block_rows = _choose_block_rows(rows, lane)

    dv3 = _to_slab_seq(dv_seq, T, rows, lane, padded)            # (T, rows, lane)
    v2 = _to_slab(v.astype(jnp.float32), rows, lane, padded)
    vth2 = _to_slab(v_th.astype(jnp.float32), rows, lane, padded)

    seq_spec = pl.BlockSpec((None, block_rows, lane), lambda r, t: (t, r, 0))
    state_spec = pl.BlockSpec((block_rows, lane), lambda r, t: (r, 0))

    spike_sds = jax.ShapeDtypeStruct((T, rows, lane), spike_dtype)
    state_sds = jax.ShapeDtypeStruct((rows, lane), jnp.float32)

    spike3, v_new2, vth_new2 = pl.pallas_call(
        _make_lif_seq_kernel(1.0 / float(tau), float(v_reset), GAMMA, THRESH_DECAY),
        out_shape=(spike_sds, state_sds, state_sds),
        grid=(pl.cdiv(rows, block_rows), T),
        in_specs=[seq_spec, state_spec, state_spec],
        out_specs=(seq_spec, state_spec, state_spec),
        compiler_params=pltpu.CompilerParams(
            dimension_semantics=("parallel", "arbitrary"),
            vmem_limit_bytes=_VMEM_LIMIT),
    )(dv3, v2, vth2)

    if padded:
        spikes = spike3.reshape(T, -1)[:, :n].reshape((T,) + state_shape)
    else:
        spikes = spike3.reshape((T,) + state_shape)
    return (spikes,
            _from_slab(v_new2, n, state_shape, padded),
            _from_slab(vth_new2, n, state_shape, padded))


# --------------------------------------------------------------------------
# pure-JAX reference (mirrors the PyTorch forward)
# --------------------------------------------------------------------------
def _lif_reference(dv, v, v_th, *, tau=1.0, v_reset=0.0):
    v = v + (dv - (v - v_reset)) / tau
    spike = (v - v_th > 0.0).astype(jnp.float32)
    v_new = (1.0 - spike) * v + spike * v_reset
    vth_new = GAMMA * spike + v_th * THRESH_DECAY
    return spike, v_new, vth_new


def _lif_reference_seq(dv_seq, v, v_th, *, tau=1.0, v_reset=0.0):
    spikes = []
    for t in range(dv_seq.shape[0]):
        s, v, v_th = _lif_reference(dv_seq[t], v, v_th, tau=tau, v_reset=v_reset)
        spikes.append(s)
    return jnp.stack(spikes), v, v_th


if __name__ == "__main__":
    key = jax.random.PRNGKey(0)
    B, C, H, W = 2, 4, 16, 16
    T = 8

    k1, k2 = jax.random.split(key)
    dv = jax.random.normal(k1, (B, C, H, W), dtype=jnp.float32) * 2.0
    dv_seq = jax.random.normal(k2, (T, B, C, H, W), dtype=jnp.float32) * 2.0

    # State after LIF.reset(): v = 0.0, v_th = v_threshold (= 1.0), per element.
    v0 = jnp.zeros((B, C, H, W), dtype=jnp.float32)
    vth0 = jnp.full((B, C, H, W), 1.0, dtype=jnp.float32)

    # --- single step ---
    spike, v1, vth1 = lif_forward(dv, v0, vth0, tau=1.0, v_reset=0.0)
    jax.block_until_ready((spike, v1, vth1))
    spike_r, v1_r, vth1_r = _lif_reference(dv, v0, vth0, tau=1.0, v_reset=0.0)
    assert jnp.array_equal(spike, spike_r), "spike mismatch"
    assert jnp.allclose(v1, v1_r, atol=1e-6), "membrane potential mismatch"
    assert jnp.allclose(vth1, vth1_r, atol=1e-6), "threshold mismatch"

    # --- second step with updated state and a different tau ---
    spike2, v2, vth2 = lif_forward(dv, v1, vth1, tau=2.0, v_reset=0.0)
    jax.block_until_ready((spike2, v2, vth2))
    spike2_r, v2_r, vth2_r = _lif_reference(dv, v1_r, vth1_r, tau=2.0, v_reset=0.0)
    assert jnp.array_equal(spike2, spike2_r), "step-2 spike mismatch"
    assert jnp.allclose(v2, v2_r, atol=1e-6), "step-2 membrane mismatch"
    assert jnp.allclose(vth2, vth2_r, atol=1e-6), "step-2 threshold mismatch"

    # --- fused T-step sequence (state resident in VMEM across steps) ---
    spikes_t, v_t, vth_t = lif_forward_sequence(dv_seq, v0, vth0, tau=1.0, v_reset=0.0)
    jax.block_until_ready((spikes_t, v_t, vth_t))
    spikes_tr, v_tr, vth_tr = _lif_reference_seq(dv_seq, v0, vth0, tau=1.0, v_reset=0.0)
    assert jnp.array_equal(spikes_t, spikes_tr), "sequence spike mismatch"
    assert jnp.allclose(v_t, v_tr, atol=1e-6), "sequence membrane mismatch"
    assert jnp.allclose(vth_t, vth_tr, atol=1e-6), "sequence threshold mismatch"

    print("KERNEL_OK")
</pallas_src>

<mosaic_0001>
module attributes {stable_mosaic.version = 11 : i64} {
  func.func @kernel(%arg0: i32, %arg1: memref<2x1024xf32, #tpu.memory_space<vmem>>, %arg2: memref<2x1024xf32, #tpu.memory_space<vmem>>, %arg3: memref<2x1024xf32, #tpu.memory_space<vmem>>, %arg4: memref<2x1024xf32, #tpu.memory_space<vmem>>, %arg5: memref<2x1024xf32, #tpu.memory_space<vmem>>, %arg6: memref<2x1024xf32, #tpu.memory_space<vmem>>) attributes {dimension_semantics = [#tpu.dimension_semantics<parallel>], iteration_bounds = array<i64: 1>, scalar_prefetch = 0 : i64, scratch_operands = 0 : i64, tpu.core_type = #tpu.core_type<tc>, window_params = [{transform_indices = @transform_0, window_bounds = array<i64: 2, 1024>}, {transform_indices = @transform_1, window_bounds = array<i64: 2, 1024>}, {transform_indices = @transform_2, window_bounds = array<i64: 2, 1024>}, {transform_indices = @transform_3, window_bounds = array<i64: 2, 1024>}, {transform_indices = @transform_4, window_bounds = array<i64: 2, 1024>}, {transform_indices = @transform_5, window_bounds = array<i64: 2, 1024>}]} {
    %c0 = arith.constant 0 : index
    %c0_0 = arith.constant 0 : index
    %0 = vector.load %arg1[%c0, %c0_0] : memref<2x1024xf32, #tpu.memory_space<vmem>>, vector<2x1024xf32>
    %c0_1 = arith.constant 0 : index
    %c0_2 = arith.constant 0 : index
    %1 = vector.load %arg2[%c0_1, %c0_2] : memref<2x1024xf32, #tpu.memory_space<vmem>>, vector<2x1024xf32>
    %c0_3 = arith.constant 0 : index
    %c0_4 = arith.constant 0 : index
    %2 = vector.load %arg3[%c0_3, %c0_4] : memref<2x1024xf32, #tpu.memory_space<vmem>>, vector<2x1024xf32>
    %cst = arith.constant 0.000000e+00 : f32
    %3 = vector.broadcast %cst : f32 to vector<2x1024xf32>
    %4 = arith.subf %1, %3 : vector<2x1024xf32>
    %5 = arith.subf %0, %4 : vector<2x1024xf32>
    %cst_5 = arith.constant 1.000000e+00 : f32
    %6 = vector.broadcast %cst_5 : f32 to vector<2x1024xf32>
    %7 = arith.mulf %5, %6 : vector<2x1024xf32>
    %8 = arith.addf %1, %7 : vector<2x1024xf32>
    %9 = arith.subf %8, %2 : vector<2x1024xf32>
    %cst_6 = arith.constant 0.000000e+00 : f32
    %10 = vector.broadcast %cst_6 : f32 to vector<2x1024xf32>
    %11 = arith.cmpf ogt, %9, %10 : vector<2x1024xf32>
    %12 = arith.extui %11 : vector<2x1024xi1> to vector<2x1024xi32>
    %13 = arith.sitofp %12 : vector<2x1024xi32> to vector<2x1024xf32>
    %c0_7 = arith.constant 0 : index
    %c0_8 = arith.constant 0 : index
    %14 = vector.load %arg4[%c0_7, %c0_8] : memref<2x1024xf32, #tpu.memory_space<vmem>>, vector<2x1024xf32>
    tpu.vector_store %arg4[%c0_7, %c0_8], %13 {strides = array<i32>} : memref<2x1024xf32, #tpu.memory_space<vmem>>, vector<2x1024xf32>,
    %cst_9 = arith.constant 0.000000e+00 : f32
    %15 = vector.broadcast %cst_9 : f32 to vector<2x1024xf32>
    %16 = arith.select %11, %15, %8 : vector<2x1024xi1>, vector<2x1024xf32>
    %c0_10 = arith.constant 0 : index
    %c0_11 = arith.constant 0 : index
    %17 = vector.load %arg5[%c0_10, %c0_11] : memref<2x1024xf32, #tpu.memory_space<vmem>>, vector<2x1024xf32>
    tpu.vector_store %arg5[%c0_10, %c0_11], %16 {strides = array<i32>} : memref<2x1024xf32, #tpu.memory_space<vmem>>, vector<2x1024xf32>,
    %cst_12 = arith.constant 0.699999988 : f32
    %18 = vector.broadcast %cst_12 : f32 to vector<2x1024xf32>
    %19 = arith.mulf %2, %18 : vector<2x1024xf32>
    %cst_13 = arith.constant 2.000000e-01 : f32
    %20 = vector.broadcast %cst_13 : f32 to vector<2x1024xf32>
    %21 = arith.addf %20, %19 : vector<2x1024xf32>
    %cst_14 = arith.constant 0.699999988 : f32
    %22 = vector.broadcast %cst_14 : f32 to vector<2x1024xf32>
    %23 = arith.mulf %2, %22 : vector<2x1024xf32>
    %24 = arith.select %11, %21, %23 : vector<2x1024xi1>, vector<2x1024xf32>
    %c0_15 = arith.constant 0 : index
    %c0_16 = arith.constant 0 : index
    %25 = vector.load %arg6[%c0_15, %c0_16] : memref<2x1024xf32, #tpu.memory_space<vmem>>, vector<2x1024xf32>
    tpu.vector_store %arg6[%c0_15, %c0_16], %24 {strides = array<i32>} : memref<2x1024xf32, #tpu.memory_space<vmem>>, vector<2x1024xf32>,
    return
  }
  func.func @transform_0(%arg0: i32) -> (i32, i32) {
    %c0_i32 = arith.constant 0 : i32
    %c0_i32_0 = arith.constant 0 : i32
    return %arg0, %c0_i32 : i32, i32
  }
  func.func @transform_1(%arg0: i32) -> (i32, i32) {
    %c0_i32 = arith.constant 0 : i32
    %c0_i32_0 = arith.constant 0 : i32
    return %arg0, %c0_i32 : i32, i32
  }
  func.func @transform_2(%arg0: i32) -> (i32, i32) {
    %c0_i32 = arith.constant 0 : i32
    %c0_i32_0 = arith.constant 0 : i32
    return %arg0, %c0_i32 : i32, i32
  }
  func.func @transform_3(%arg0: i32) -> (i32, i32) {
    %c0_i32 = arith.constant 0 : i32
    %c0_i32_0 = arith.constant 0 : i32
    return %arg0, %c0_i32 : i32, i32
  }
  func.func @transform_4(%arg0: i32) -> (i32, i32) {
    %c0_i32 = arith.constant 0 : i32
    %c0_i32_0 = arith.constant 0 : i32
    return %arg0, %c0_i32 : i32, i32
  }
  func.func @transform_5(%arg0: i32) -> (i32, i32) {
    %c0_i32 = arith.constant 0 : i32
    %c0_i32_0 = arith.constant 0 : i32
    return %arg0, %c0_i32 : i32, i32
  }
}

</mosaic_0001>

<bundles_post_ra>
// kernel: lif_forward.1
= control target key start
LH: loop header
LB: loop body
LE: loop exit
PB: predicated region body
PF: predicated region fallthrough
CT: control target
= control target key end

     0   :  { %v64_v16 = vmov 0.0   ;;  %s131_s0 = inlined_call_operand.vmem [shape: f32[2,1024], index: 0, kind: input, shape index: {}]   ;;  %s132_s1 = inlined_call_operand.vmem [shape: f32[2,1024], index: 1, kind: input, shape index: {}]   ;;  %s133_s2 = inlined_call_operand.vmem [shape: f32[2,1024], index: 2, kind: input, shape index: {}]   ;;  %s134_s3 = inlined_call_operand.vmem [shape: f32[2,1024], index: 3, kind: output, shape index: {0}]   ;;  %s135_s4 = inlined_call_operand.vmem [shape: f32[2,1024], index: 4, kind: output, shape index: {1}]   ;;  %s136_s5 = inlined_call_operand.vmem [shape: f32[2,1024], index: 5, kind: output, shape index: {2}]  }
   0x1   :  { %v17_v0 = vld [vmem:[%s131_s0] sm:$0xff]  ;;  %v18_v4 = vld [vmem:[%s131_s0 + $0x8] sm:$0xff] }
   0x2   :  { %v19_v1 = vld [vmem:[%s132_s1] sm:$0xff]  ;;  %v20_v5 = vld [vmem:[%s132_s1 + $0x8] sm:$0xff] }
   0x3   :  { %v21_v2 = vld [vmem:[%s133_s2] sm:$0xff]  ;;  %v23_v3 = vsub.f32 %v17_v0, %v19_v1  ;;  %v22_v6 = vld [vmem:[%s133_s2 + $0x8] sm:$0xff]  ;;  %v24_v8 = vsub.f32 %v18_v4, %v20_v5 }
   0x4   :  { %v41_v7 = vmul.f32 0.7, %v21_v2  ;;  %v42_v9 = vmul.f32 0.7, %v22_v6 }
   0x5   :  { %v25_v10 = vadd.f32 %v23_v3, %v19_v1  ;;  %v26_v11 = vadd.f32 %v24_v8, %v20_v5 }
   0x6   :  { %v43_v12 = vadd.f32 0.2, %v41_v7  ;;  %v44_v14 = vadd.f32 0.2, %v42_v9 }
   0x7   :  { %v27_v13 = vsub.f32 %v25_v10, %v21_v2  ;;  %v28_v15 = vsub.f32 %v26_v11, %v22_v6 }
   0x9   :  { %vm29_vm0 = vcmp.gt.f32.partialorder %v27_v13, 0.0  ;;  %vm30_vm1 = vcmp.gt.f32.partialorder %v28_v15, 0.0 }
   0xa   :  { %v61_v17 = vsel %vm29_vm0, 1.0, %v64_v16  ;;  %v37_v18 = vsel %vm29_vm0, 0.0, %v25_v10  ;;  %v45_v19 = vsel %vm29_vm0, %v43_v12, %v41_v7  ;;  %v62_v20 = vsel %vm30_vm1, 1.0, %v64_v16 }
   0xb   :  { %35 = vst [vmem:[%s134_s3] sm:$0xff] %v61_v17  ;;  %39 = vst [vmem:[%s135_s4] sm:$0xff] %v37_v18  ;;  %v38_v21 = vsel %vm30_vm1, 0.0, %v26_v11  ;;  %v46_v22 = vsel %vm30_vm1, %v44_v14, %v42_v9 }
   0xc   :  { %47 = vst [vmem:[%s136_s5] sm:$0xff] %v45_v19  ;;  %36 = vst [vmem:[%s134_s3 + $0x8] sm:$0xff] %v62_v20 }
   0xd   :  { %40 = vst [vmem:[%s135_s4 + $0x8] sm:$0xff] %v38_v21  ;;  %48 = vst [vmem:[%s136_s5 + $0x8] sm:$0xff] %v46_v22 }

</bundles_post_ra>
